<compile_context>
chip_gen: v7x
topology: tpu7x:2x2x1
jax: 0.10.0
libtpu: 0.0.40
codegen_flags: <defaults>
</compile_context>

<pallas_src>
import jax
import jax.numpy as jnp
from jax.experimental import pallas as pl
from jax.experimental.pallas import tpu as pltpu

_EPS = 1e-5
_MM_DTYPE = jnp.bfloat16          # MXU compute dtype (f32 accumulate)


# --------------------------- weight preparation ----------------------------- #

def _banded_conv_weights(wk, width):
    """wk: (3, 3, Cin, Cout) -> (3, width*Cin, width*Cout) block-tridiagonal mats.

    band[ky][w_in*Cin + ci, w_out*Cout + co] = wk[ky, kx, ci, co] with
    kx = w_in - w_out + 1; entries falling outside the image implement the 3x3
    conv's width zero-padding, so kernel inputs only need HEIGHT padding.
    """
    kh, kw, cin, cout = wk.shape
    bands = []
    for ky in range(kh):
        band = jnp.zeros((width * cin, width * cout), wk.dtype)
        for kx in range(kw):
            dx = kx - 1                                  # input col offset
            eye = jnp.eye(width, k=-dx, dtype=wk.dtype)  # ones at [w_out+dx, w_out]
            band = band + jnp.kron(eye, wk[ky, kx])
        bands.append(band)
    return jnp.stack(bands, axis=0)


def make_params(w1_oihw, w2_oihw, ws_oihw, g1, beta1, g2, beta2, bs, width):
    """Kernel-layout parameters (conv biases b1/b2 intentionally unused: a
    per-channel bias cancels exactly in training-mode BatchNorm)."""
    cout, cin = w1_oihw.shape[0], w1_oihw.shape[1]
    w1_k = jnp.transpose(w1_oihw, (2, 3, 1, 0))        # (3,3,cin,cout)
    w2_k = jnp.transpose(w2_oihw, (2, 3, 1, 0))        # (3,3,cout,cout)
    ws_m = ws_oihw.reshape(cout, cin).T                # (cin,cout)
    return {
        "wb1": _banded_conv_weights(w1_k, width).astype(_MM_DTYPE),
        "wb2": _banded_conv_weights(w2_k, width).astype(_MM_DTYPE),
        "wskip": jnp.kron(jnp.eye(width, dtype=jnp.float32), ws_m).astype(_MM_DTYPE),
        "g1": g1, "beta1": beta1, "g2": g2, "beta2": beta2, "bs": bs,
    }


# ------------------------------- forward pass ------------------------------- #

def residual_block_forward(x_nchw, params):
    """Input/output are NCHW (PyTorch convention)."""
    b, cin, h, w = x_nchw.shape
    cout = params["g1"].shape[0]
    wc_in, wc_out = w * cin, w * cout
    n_total = b * h * w
    # Lane-dense layout (and the f32 row-slice trick) relies on W*Cout % 128 == 0.
    assert wc_out % 128 == 0, "generalize N-tiling for W*Cout not multiple of 128"

    # NHWC rows; one zero row of height padding top/bottom (width padding is in
    # the banded weights).  bf16 at the pallas boundary -> half the DMA bytes.
    x_nhwc = jnp.transpose(x_nchw, (0, 2, 3, 1))
    x_hpad = jnp.pad(x_nhwc, ((0, 0), (1, 1), (0, 0), (0, 0)))
    x_hpad = x_hpad.reshape(b, h + 2, wc_in).astype(_MM_DTYPE)

    grid = (b,)
    cparams = pltpu.CompilerParams(dimension_semantics=("parallel",))

    # ------- pass A: conv1 + 1x1 skip + BN1 partial stats (one image/step) ---- #
    def conv1_kernel(xh_ref, w1_ref, ws_ref, y_ref, v_ref, st_ref):
        xh = xh_ref[...]                                        # (H+2, W*Cin) bf16
        p0 = jnp.dot(xh, w1_ref[0], preferred_element_type=jnp.float32)
        p1 = jnp.dot(xh, w1_ref[1], preferred_element_type=jnp.float32)
        p2 = jnp.dot(xh, w1_ref[2], preferred_element_type=jnp.float32)
        acc = p0[0:h] + p1[1:h + 1] + p2[2:h + 2]               # (H, W*Cout) f32
        y_ref[...] = acc.astype(y_ref.dtype)                    # bf16 activation
        sk = jnp.dot(xh, ws_ref[...], preferred_element_type=jnp.float32)
        v_ref[...] = sk[1:h + 1].astype(v_ref.dtype)            # skip path (bf16)
        s = jnp.sum(acc, axis=0, keepdims=True)                 # (1, W*Cout)
        q = jnp.sum(acc * acc, axis=0, keepdims=True)
        st_ref[...] = jnp.concatenate([s, q], axis=0)           # (2, W*Cout)

    y1, v_skip, st1 = pl.pallas_call(
        conv1_kernel,
        out_shape=(jax.ShapeDtypeStruct((b, h, wc_out), _MM_DTYPE),
                   jax.ShapeDtypeStruct((b, h, wc_out), _MM_DTYPE),
                   jax.ShapeDtypeStruct((b, 2, wc_out), jnp.float32)),
        grid=grid,
        in_specs=[
            pl.BlockSpec((None, h + 2, wc_in), lambda bi: (bi, 0, 0)),
            pl.BlockSpec((3, wc_in, wc_out), lambda bi: (0, 0, 0)),
            pl.BlockSpec((wc_in, wc_out), lambda bi: (0, 0)),
        ],
        out_specs=(
            pl.BlockSpec((None, h, wc_out), lambda bi: (bi, 0, 0)),
            pl.BlockSpec((None, h, wc_out), lambda bi: (bi, 0, 0)),
            pl.BlockSpec((None, 2, wc_out), lambda bi: (bi, 0, 0)),
        ),
        compiler_params=cparams,
    )(x_hpad, params["wb1"], params["wskip"])

    # BN1 scale / shift from cross-image partial sums (tiny XLA reduction).
    # NOTE: E[x^2]-E[x]^2 in f32 is fine at this size; use centered per-tile sums
    # for much larger tensors.
    s1 = jnp.sum(st1, axis=0).reshape(2, w, cout).sum(axis=1)   # (2, Cout)
    mu1 = s1[0] / n_total
    var1 = jnp.maximum(s1[1] / n_total - mu1 * mu1, 0.0)
    scale1 = params["g1"] * jax.lax.rsqrt(var1 + _EPS)
    shift1 = params["beta1"] - mu1 * scale1
    scale1_row = jnp.tile(scale1.reshape(1, cout), (1, w))      # (1, W*Cout)
    shift1_row = jnp.tile(shift1.reshape(1, cout), (1, w))

    # ------------- pass B: BN1 affine + ReLU, conv2, BN2 partial stats -------- #
    def conv2_kernel(y1_ref, w2_ref, sc_ref, sh_ref, u_ref, st_ref):
        y1b = y1_ref[...].astype(jnp.float32)                   # (H, W*Cout)
        hid = jnp.maximum(y1b * sc_ref[...] + sh_ref[...], 0.0)
        z = jnp.zeros((1, wc_out), jnp.float32)
        hp = jnp.concatenate([z, hid, z], axis=0).astype(_MM_DTYPE)  # height halo
        p0 = jnp.dot(hp, w2_ref[0], preferred_element_type=jnp.float32)
        p1 = jnp.dot(hp, w2_ref[1], preferred_element_type=jnp.float32)
        p2 = jnp.dot(hp, w2_ref[2], preferred_element_type=jnp.float32)
        acc = p0[0:h] + p1[1:h + 1] + p2[2:h + 2]               # (H, W*Cout) f32
        u_ref[...] = acc
        s = jnp.sum(acc, axis=0, keepdims=True)
        q = jnp.sum(acc * acc, axis=0, keepdims=True)
        st_ref[...] = jnp.concatenate([s, q], axis=0)

    u2, st2 = pl.pallas_call(
        conv2_kernel,
        out_shape=(jax.ShapeDtypeStruct((b, h, wc_out), jnp.float32),
                   jax.ShapeDtypeStruct((b, 2, wc_out), jnp.float32)),
        grid=grid,
        in_specs=[
            pl.BlockSpec((None, h, wc_out), lambda bi: (bi, 0, 0)),
            pl.BlockSpec((3, wc_out, wc_out), lambda bi: (0, 0, 0)),
            pl.BlockSpec((1, wc_out), lambda bi: (0, 0)),
            pl.BlockSpec((1, wc_out), lambda bi: (0, 0)),
        ],
        out_specs=(
            pl.BlockSpec((None, h, wc_out), lambda bi: (bi, 0, 0)),
            pl.BlockSpec((None, 2, wc_out), lambda bi: (bi, 0, 0)),
        ),
        compiler_params=cparams,
    )(y1, params["wb2"], scale1_row, shift1_row)

    # BN2 scale / shift (skip-conv bias folded in) + finalize, fused by XLA with
    # the output reshape/transpose (former pass C removed).
    s2 = jnp.sum(st2, axis=0).reshape(2, w, cout).sum(axis=1)
    mu2 = s2[0] / n_total
    var2 = jnp.maximum(s2[1] / n_total - mu2 * mu2, 0.0)
    scale2 = params["g2"] * jax.lax.rsqrt(var2 + _EPS)
    c2 = params["beta2"] - mu2 * scale2 + params["bs"]

    u2r = u2.reshape(b, h, w, cout)
    vr = v_skip.astype(jnp.float32).reshape(b, h, w, cout)
    out = jnp.maximum(u2r * scale2.reshape(1, 1, 1, cout)
                      + c2.reshape(1, 1, 1, cout) + vr, 0.0)
    return jnp.transpose(out, (0, 3, 1, 2))


# --------------------------- reference (pure JAX) --------------------------- #

def _reference_forward(x_nchw, p):
    def conv(x, w_oihw, bias, pad):
        y = jax.lax.conv_general_dilated(
            x, w_oihw, (1, 1), [(pad, pad), (pad, pad)],
            dimension_numbers=("NCHW", "OIHW", "NCHW"))
        return y + bias.reshape(1, -1, 1, 1)

    def bn(x, g, beta):
        mu = jnp.mean(x, axis=(0, 2, 3), keepdims=True)
        var = jnp.mean((x - mu) ** 2, axis=(0, 2, 3), keepdims=True)
        return ((x - mu) * jax.lax.rsqrt(var + _EPS)
                * g.reshape(1, -1, 1, 1) + beta.reshape(1, -1, 1, 1))

    h = jax.nn.relu(bn(conv(x_nchw, p["w1_oihw"], p["b1v"], 1), p["g1v"], p["beta1v"]))
    h = bn(conv(h, p["w2_oihw"], p["b2v"], 1), p["g2v"], p["beta2v"])
    skip = conv(x_nchw, p["ws_oihw"], p["bsv"], 0)
    return jax.nn.relu(h + skip)


# ---------------------------------- main ------------------------------------ #

if __name__ == "__main__":
    B, CIN, COUT, H, W = 2, 4, 8, 16, 16   # in_channels != out_channels -> 1x1 skip

    key = jax.random.PRNGKey(0)
    ks = jax.random.split(key, 12)

    # PyTorch-layout (OIHW) deterministic parameter init
    w1_oihw = 0.1 * jax.random.normal(ks[0], (COUT, CIN, 3, 3), jnp.float32)
    b1 = 0.1 * jax.random.normal(ks[1], (COUT,), jnp.float32)
    g1 = 1.0 + 0.1 * jax.random.normal(ks[2], (COUT,), jnp.float32)
    beta1 = 0.1 * jax.random.normal(ks[3], (COUT,), jnp.float32)

    w2_oihw = 0.1 * jax.random.normal(ks[4], (COUT, COUT, 3, 3), jnp.float32)
    b2 = 0.1 * jax.random.normal(ks[5], (COUT,), jnp.float32)
    g2 = 1.0 + 0.1 * jax.random.normal(ks[6], (COUT,), jnp.float32)
    beta2 = 0.1 * jax.random.normal(ks[7], (COUT,), jnp.float32)

    ws_oihw = 0.1 * jax.random.normal(ks[8], (COUT, CIN, 1, 1), jnp.float32)
    bs = 0.1 * jax.random.normal(ks[9], (COUT,), jnp.float32)

    # NOTE: conv biases b1/b2 are not fed to the kernels: a per-channel bias added
    # before *training-mode* BatchNorm cancels exactly in (x - mean).  This block,
    # like the nn.Module forward, always uses batch statistics.
    params = make_params(w1_oihw, w2_oihw, ws_oihw, g1, beta1, g2, beta2, bs, W)
    ref_params = {
        "w1_oihw": w1_oihw, "b1v": b1, "g1v": g1, "beta1v": beta1,
        "w2_oihw": w2_oihw, "b2v": b2, "g2v": g2, "beta2v": beta2,
        "ws_oihw": ws_oihw, "bsv": bs,
    }

    x = jax.random.normal(ks[10], (B, CIN, H, W), jnp.float32)   # NCHW

    fwd = jax.jit(residual_block_forward)
    out = jax.block_until_ready(fwd(x, params))
    ref = jax.block_until_ready(_reference_forward(x, ref_params))

    assert out.shape == (B, COUT, H, W), out.shape
    # bf16 MXU compute + bf16 intermediates vs f32 reference -> loose tolerance.
    tol = 4e-2 if _MM_DTYPE == jnp.bfloat16 else 1e-4
    max_err = float(jnp.max(jnp.abs(out - ref)))
    assert jnp.allclose(out, ref, atol=tol, rtol=tol), max_err
    print("KERNEL_OK")
</pallas_src>

<mosaic_0001>
module attributes {stable_mosaic.version = 11 : i64} {
  func.func @conv1_kernel(%arg0: i32, %arg1: memref<1x18x64xbf16, #tpu.memory_space<vmem>>, %arg2: memref<3x64x128xbf16, #tpu.memory_space<vmem>>, %arg3: memref<64x128xbf16, #tpu.memory_space<vmem>>, %arg4: memref<1x16x128xbf16, #tpu.memory_space<vmem>>, %arg5: memref<1x16x128xbf16, #tpu.memory_space<vmem>>, %arg6: memref<1x2x128xf32, #tpu.memory_space<vmem>>) attributes {dimension_semantics = [#tpu.dimension_semantics<parallel>], iteration_bounds = array<i64: 2>, scalar_prefetch = 0 : i64, scratch_operands = 0 : i64, tpu.core_type = #tpu.core_type<tc>, window_params = [{transform_indices = @transform_0, window_bounds = array<i64: 1, 18, 64>}, {pipeline_mode = #tpu.pipeline_mode<synchronous>, transform_indices = @transform_1, window_bounds = array<i64: 3, 64, 128>}, {pipeline_mode = #tpu.pipeline_mode<synchronous>, transform_indices = @transform_2, window_bounds = array<i64: 64, 128>}, {transform_indices = @transform_3, window_bounds = array<i64: 1, 16, 128>}, {transform_indices = @transform_4, window_bounds = array<i64: 1, 16, 128>}, {transform_indices = @transform_5, window_bounds = array<i64: 1, 2, 128>}]} {
    %c0 = arith.constant 0 : index
    %c0_0 = arith.constant 0 : index
    %c0_1 = arith.constant 0 : index
    %0 = vector.load %arg1[%c0, %c0_0, %c0_1] : memref<1x18x64xbf16, #tpu.memory_space<vmem>>, vector<1x18x64xbf16>
    %1 = vector.shape_cast %0 : vector<1x18x64xbf16> to vector<18x64xbf16>
    %c0_2 = arith.constant 0 : index
    %c0_3 = arith.constant 0 : index
    %c0_4 = arith.constant 0 : index
    %2 = vector.load %arg2[%c0_2, %c0_3, %c0_4] : memref<3x64x128xbf16, #tpu.memory_space<vmem>>, vector<1x64x128xbf16>
    %3 = vector.shape_cast %2 : vector<1x64x128xbf16> to vector<64x128xbf16>
    %cst = arith.constant dense<0.000000e+00> : vector<18x128xf32>
    %4 = tpu.matmul %1, %3, %cst {dimension_numbers = #tpu.dot_dimension_numbers<[1], [0], [0], [1], [0, 0, 1, 1], [], []>} : vector<18x64xbf16>, vector<64x128xbf16>, vector<18x128xf32> -> vector<18x128xf32>
    %c1 = arith.constant 1 : index
    %c0_5 = arith.constant 0 : index
    %c0_6 = arith.constant 0 : index
    %5 = vector.load %arg2[%c1, %c0_5, %c0_6] : memref<3x64x128xbf16, #tpu.memory_space<vmem>>, vector<1x64x128xbf16>
    %6 = vector.shape_cast %5 : vector<1x64x128xbf16> to vector<64x128xbf16>
    %cst_7 = arith.constant dense<0.000000e+00> : vector<18x128xf32>
    %7 = tpu.matmul %1, %6, %cst_7 {dimension_numbers = #tpu.dot_dimension_numbers<[1], [0], [0], [1], [0, 0, 1, 1], [], []>} : vector<18x64xbf16>, vector<64x128xbf16>, vector<18x128xf32> -> vector<18x128xf32>
    %c2 = arith.constant 2 : index
    %c0_8 = arith.constant 0 : index
    %c0_9 = arith.constant 0 : index
    %8 = vector.load %arg2[%c2, %c0_8, %c0_9] : memref<3x64x128xbf16, #tpu.memory_space<vmem>>, vector<1x64x128xbf16>
    %9 = vector.shape_cast %8 : vector<1x64x128xbf16> to vector<64x128xbf16>
    %cst_10 = arith.constant dense<0.000000e+00> : vector<18x128xf32>
    %10 = tpu.matmul %1, %9, %cst_10 {dimension_numbers = #tpu.dot_dimension_numbers<[1], [0], [0], [1], [0, 0, 1, 1], [], []>} : vector<18x64xbf16>, vector<64x128xbf16>, vector<18x128xf32> -> vector<18x128xf32>
    %11 = vector.extract_strided_slice %4 {offsets = [0, 0], sizes = [16, 128], strides = [1, 1]} : vector<18x128xf32> to vector<16x128xf32>
    %12 = vector.extract_strided_slice %7 {offsets = [1, 0], sizes = [16, 128], strides = [1, 1]} : vector<18x128xf32> to vector<16x128xf32>
    %13 = arith.addf %11, %12 : vector<16x128xf32>
    %14 = vector.extract_strided_slice %10 {offsets = [2, 0], sizes = [16, 128], strides = [1, 1]} : vector<18x128xf32> to vector<16x128xf32>
    %15 = arith.addf %13, %14 : vector<16x128xf32>
    %16 = arith.truncf %15 : vector<16x128xf32> to vector<16x128xbf16>
    %c0_11 = arith.constant 0 : index
    %c0_12 = arith.constant 0 : index
    %c0_13 = arith.constant 0 : index
    %17 = vector.load %arg4[%c0_11, %c0_12, %c0_13] : memref<1x16x128xbf16, #tpu.memory_space<vmem>>, vector<1x16x128xbf16>
    %18 = vector.shape_cast %17 : vector<1x16x128xbf16> to vector<16x128xbf16>
    %19 = vector.shape_cast %16 : vector<16x128xbf16> to vector<1x16x128xbf16>
    tpu.vector_store %arg4[%c0_11, %c0_12, %c0_13], %19 {strides = array<i32>} : memref<1x16x128xbf16, #tpu.memory_space<vmem>>, vector<1x16x128xbf16>,
    %c0_14 = arith.constant 0 : index
    %c0_15 = arith.constant 0 : index
    %20 = vector.load %arg3[%c0_14, %c0_15] : memref<64x128xbf16, #tpu.memory_space<vmem>>, vector<64x128xbf16>
    %cst_16 = arith.constant dense<0.000000e+00> : vector<18x128xf32>
    %21 = tpu.matmul %1, %20, %cst_16 {dimension_numbers = #tpu.dot_dimension_numbers<[1], [0], [0], [1], [0, 0, 1, 1], [], []>} : vector<18x64xbf16>, vector<64x128xbf16>, vector<18x128xf32> -> vector<18x128xf32>
    %22 = vector.extract_strided_slice %21 {offsets = [1, 0], sizes = [16, 128], strides = [1, 1]} : vector<18x128xf32> to vector<16x128xf32>
    %23 = arith.truncf %22 : vector<16x128xf32> to vector<16x128xbf16>
    %c0_17 = arith.constant 0 : index
    %c0_18 = arith.constant 0 : index
    %c0_19 = arith.constant 0 : index
    %24 = vector.load %arg5[%c0_17, %c0_18, %c0_19] : memref<1x16x128xbf16, #tpu.memory_space<vmem>>, vector<1x16x128xbf16>
    %25 = vector.shape_cast %24 : vector<1x16x128xbf16> to vector<16x128xbf16>
    %26 = vector.shape_cast %23 : vector<16x128xbf16> to vector<1x16x128xbf16>
    tpu.vector_store %arg5[%c0_17, %c0_18, %c0_19], %26 {strides = array<i32>} : memref<1x16x128xbf16, #tpu.memory_space<vmem>>, vector<1x16x128xbf16>,
    %cst_20 = arith.constant dense<0.000000e+00> : vector<128xf32>
    %27 = vector.multi_reduction <add>, %15, %cst_20 [0] : vector<16x128xf32> to vector<128xf32>
    %28 = vector.shape_cast %27 : vector<128xf32> to vector<1x128xf32>
    %29 = arith.mulf %15, %15 : vector<16x128xf32>
    %cst_21 = arith.constant dense<0.000000e+00> : vector<128xf32>
    %30 = vector.multi_reduction <add>, %29, %cst_21 [0] : vector<16x128xf32> to vector<128xf32>
    %31 = vector.shape_cast %30 : vector<128xf32> to vector<1x128xf32>
    %32 = tpu.concatenate %28, %31 in 0 : vector<1x128xf32>, vector<1x128xf32> -> vector<2x128xf32>
    %c0_22 = arith.constant 0 : index
    %c0_23 = arith.constant 0 : index
    %c0_24 = arith.constant 0 : index
    %33 = vector.load %arg6[%c0_22, %c0_23, %c0_24] : memref<1x2x128xf32, #tpu.memory_space<vmem>>, vector<1x2x128xf32>
    %34 = vector.shape_cast %33 : vector<1x2x128xf32> to vector<2x128xf32>
    %35 = vector.shape_cast %32 : vector<2x128xf32> to vector<1x2x128xf32>
    tpu.vector_store %arg6[%c0_22, %c0_23, %c0_24], %35 {strides = array<i32>} : memref<1x2x128xf32, #tpu.memory_space<vmem>>, vector<1x2x128xf32>,
    return
  }
  func.func @transform_0(%arg0: i32) -> (i32, i32, i32) {
    %c0_i32 = arith.constant 0 : i32
    %c0_i32_0 = arith.constant 0 : i32
    %c0_i32_1 = arith.constant 0 : i32
    return %arg0, %c0_i32, %c0_i32_0 : i32, i32, i32
  }
  func.func @transform_1(%arg0: i32) -> (i32, i32, i32) {
    %c0_i32 = arith.constant 0 : i32
    %c0_i32_0 = arith.constant 0 : i32
    %c0_i32_1 = arith.constant 0 : i32
    %c0_i32_2 = arith.constant 0 : i32
    return %c0_i32, %c0_i32_0, %c0_i32_1 : i32, i32, i32
  }
  func.func @transform_2(%arg0: i32) -> (i32, i32) {
    %c0_i32 = arith.constant 0 : i32
    %c0_i32_0 = arith.constant 0 : i32
    %c0_i32_1 = arith.constant 0 : i32
    return %c0_i32, %c0_i32_0 : i32, i32
  }
  func.func @transform_3(%arg0: i32) -> (i32, i32, i32) {
    %c0_i32 = arith.constant 0 : i32
    %c0_i32_0 = arith.constant 0 : i32
    %c0_i32_1 = arith.constant 0 : i32
    return %arg0, %c0_i32, %c0_i32_0 : i32, i32, i32
  }
  func.func @transform_4(%arg0: i32) -> (i32, i32, i32) {
    %c0_i32 = arith.constant 0 : i32
    %c0_i32_0 = arith.constant 0 : i32
    %c0_i32_1 = arith.constant 0 : i32
    return %arg0, %c0_i32, %c0_i32_0 : i32, i32, i32
  }
  func.func @transform_5(%arg0: i32) -> (i32, i32, i32) {
    %c0_i32 = arith.constant 0 : i32
    %c0_i32_0 = arith.constant 0 : i32
    %c0_i32_1 = arith.constant 0 : i32
    return %arg0, %c0_i32, %c0_i32_0 : i32, i32, i32
  }
}

module attributes {stable_mosaic.version = 11 : i64} {
  func.func @conv2_kernel(%arg0: i32, %arg1: memref<1x16x128xbf16, #tpu.memory_space<vmem>>, %arg2: memref<3x128x128xbf16, #tpu.memory_space<vmem>>, %arg3: memref<1x128xf32, #tpu.memory_space<vmem>>, %arg4: memref<1x128xf32, #tpu.memory_space<vmem>>, %arg5: memref<1x16x128xf32, #tpu.memory_space<vmem>>, %arg6: memref<1x2x128xf32, #tpu.memory_space<vmem>>) attributes {dimension_semantics = [#tpu.dimension_semantics<parallel>], iteration_bounds = array<i64: 2>, scalar_prefetch = 0 : i64, scratch_operands = 0 : i64, tpu.core_type = #tpu.core_type<tc>, window_params = [{transform_indices = @transform_0, window_bounds = array<i64: 1, 16, 128>}, {pipeline_mode = #tpu.pipeline_mode<synchronous>, transform_indices = @transform_1, window_bounds = array<i64: 3, 128, 128>}, {pipeline_mode = #tpu.pipeline_mode<synchronous>, transform_indices = @transform_2, window_bounds = array<i64: 1, 128>}, {pipeline_mode = #tpu.pipeline_mode<synchronous>, transform_indices = @transform_3, window_bounds = array<i64: 1, 128>}, {transform_indices = @transform_4, window_bounds = array<i64: 1, 16, 128>}, {transform_indices = @transform_5, window_bounds = array<i64: 1, 2, 128>}]} {
    %c0 = arith.constant 0 : index
    %c0_0 = arith.constant 0 : index
    %c0_1 = arith.constant 0 : index
    %0 = vector.load %arg1[%c0, %c0_0, %c0_1] : memref<1x16x128xbf16, #tpu.memory_space<vmem>>, vector<1x16x128xbf16>
    %1 = vector.shape_cast %0 : vector<1x16x128xbf16> to vector<16x128xbf16>
    %2 = arith.extf %1 : vector<16x128xbf16> to vector<16x128xf32>
    %c0_2 = arith.constant 0 : index
    %c0_3 = arith.constant 0 : index
    %3 = vector.load %arg3[%c0_2, %c0_3] : memref<1x128xf32, #tpu.memory_space<vmem>>, vector<1x128xf32>
    %4 = vector.broadcast %3 : vector<1x128xf32> to vector<16x128xf32>
    %5 = arith.mulf %2, %4 : vector<16x128xf32>
    %c0_4 = arith.constant 0 : index
    %c0_5 = arith.constant 0 : index
    %6 = vector.load %arg4[%c0_4, %c0_5] : memref<1x128xf32, #tpu.memory_space<vmem>>, vector<1x128xf32>
    %7 = vector.broadcast %6 : vector<1x128xf32> to vector<16x128xf32>
    %8 = arith.addf %5, %7 : vector<16x128xf32>
    %cst = arith.constant 0.000000e+00 : f32
    %9 = vector.broadcast %cst : f32 to vector<16x128xf32>
    %10 = arith.maximumf %8, %9 : vector<16x128xf32>
    %cst_6 = arith.constant 0.000000e+00 : f32
    %11 = vector.broadcast %cst_6 : f32 to vector<1x128xf32>
    %12 = tpu.concatenate %11, %10, %11 in 0 : vector<1x128xf32>, vector<16x128xf32>, vector<1x128xf32> -> vector<18x128xf32>
    %13 = arith.truncf %12 : vector<18x128xf32> to vector<18x128xbf16>
    %c0_7 = arith.constant 0 : index
    %c0_8 = arith.constant 0 : index
    %c0_9 = arith.constant 0 : index
    %14 = vector.load %arg2[%c0_7, %c0_8, %c0_9] : memref<3x128x128xbf16, #tpu.memory_space<vmem>>, vector<1x128x128xbf16>
    %15 = vector.shape_cast %14 : vector<1x128x128xbf16> to vector<128x128xbf16>
    %cst_10 = arith.constant dense<0.000000e+00> : vector<18x128xf32>
    %16 = tpu.matmul %13, %15, %cst_10 {dimension_numbers = #tpu.dot_dimension_numbers<[1], [0], [0], [1], [0, 0, 1, 1], [], []>} : vector<18x128xbf16>, vector<128x128xbf16>, vector<18x128xf32> -> vector<18x128xf32>
    %c1 = arith.constant 1 : index
    %c0_11 = arith.constant 0 : index
    %c0_12 = arith.constant 0 : index
    %17 = vector.load %arg2[%c1, %c0_11, %c0_12] : memref<3x128x128xbf16, #tpu.memory_space<vmem>>, vector<1x128x128xbf16>
    %18 = vector.shape_cast %17 : vector<1x128x128xbf16> to vector<128x128xbf16>
    %cst_13 = arith.constant dense<0.000000e+00> : vector<18x128xf32>
    %19 = tpu.matmul %13, %18, %cst_13 {dimension_numbers = #tpu.dot_dimension_numbers<[1], [0], [0], [1], [0, 0, 1, 1], [], []>} : vector<18x128xbf16>, vector<128x128xbf16>, vector<18x128xf32> -> vector<18x128xf32>
    %c2 = arith.constant 2 : index
    %c0_14 = arith.constant 0 : index
    %c0_15 = arith.constant 0 : index
    %20 = vector.load %arg2[%c2, %c0_14, %c0_15] : memref<3x128x128xbf16, #tpu.memory_space<vmem>>, vector<1x128x128xbf16>
    %21 = vector.shape_cast %20 : vector<1x128x128xbf16> to vector<128x128xbf16>
    %cst_16 = arith.constant dense<0.000000e+00> : vector<18x128xf32>
    %22 = tpu.matmul %13, %21, %cst_16 {dimension_numbers = #tpu.dot_dimension_numbers<[1], [0], [0], [1], [0, 0, 1, 1], [], []>} : vector<18x128xbf16>, vector<128x128xbf16>, vector<18x128xf32> -> vector<18x128xf32>
    %23 = vector.extract_strided_slice %16 {offsets = [0, 0], sizes = [16, 128], strides = [1, 1]} : vector<18x128xf32> to vector<16x128xf32>
    %24 = vector.extract_strided_slice %19 {offsets = [1, 0], sizes = [16, 128], strides = [1, 1]} : vector<18x128xf32> to vector<16x128xf32>
    %25 = arith.addf %23, %24 : vector<16x128xf32>
    %26 = vector.extract_strided_slice %22 {offsets = [2, 0], sizes = [16, 128], strides = [1, 1]} : vector<18x128xf32> to vector<16x128xf32>
    %27 = arith.addf %25, %26 : vector<16x128xf32>
    %c0_17 = arith.constant 0 : index
    %c0_18 = arith.constant 0 : index
    %c0_19 = arith.constant 0 : index
    %28 = vector.load %arg5[%c0_17, %c0_18, %c0_19] : memref<1x16x128xf32, #tpu.memory_space<vmem>>, vector<1x16x128xf32>
    %29 = vector.shape_cast %28 : vector<1x16x128xf32> to vector<16x128xf32>
    %30 = vector.shape_cast %27 : vector<16x128xf32> to vector<1x16x128xf32>
    tpu.vector_store %arg5[%c0_17, %c0_18, %c0_19], %30 {strides = array<i32>} : memref<1x16x128xf32, #tpu.memory_space<vmem>>, vector<1x16x128xf32>,
    %cst_20 = arith.constant dense<0.000000e+00> : vector<128xf32>
    %31 = vector.multi_reduction <add>, %27, %cst_20 [0] : vector<16x128xf32> to vector<128xf32>
    %32 = vector.shape_cast %31 : vector<128xf32> to vector<1x128xf32>
    %33 = arith.mulf %27, %27 : vector<16x128xf32>
    %cst_21 = arith.constant dense<0.000000e+00> : vector<128xf32>
    %34 = vector.multi_reduction <add>, %33, %cst_21 [0] : vector<16x128xf32> to vector<128xf32>
    %35 = vector.shape_cast %34 : vector<128xf32> to vector<1x128xf32>
    %36 = tpu.concatenate %32, %35 in 0 : vector<1x128xf32>, vector<1x128xf32> -> vector<2x128xf32>
    %c0_22 = arith.constant 0 : index
    %c0_23 = arith.constant 0 : index
    %c0_24 = arith.constant 0 : index
    %37 = vector.load %arg6[%c0_22, %c0_23, %c0_24] : memref<1x2x128xf32, #tpu.memory_space<vmem>>, vector<1x2x128xf32>
    %38 = vector.shape_cast %37 : vector<1x2x128xf32> to vector<2x128xf32>
    %39 = vector.shape_cast %36 : vector<2x128xf32> to vector<1x2x128xf32>
    tpu.vector_store %arg6[%c0_22, %c0_23, %c0_24], %39 {strides = array<i32>} : memref<1x2x128xf32, #tpu.memory_space<vmem>>, vector<1x2x128xf32>,
    return
  }
  func.func @transform_0(%arg0: i32) -> (i32, i32, i32) {
    %c0_i32 = arith.constant 0 : i32
    %c0_i32_0 = arith.constant 0 : i32
    %c0_i32_1 = arith.constant 0 : i32
    return %arg0, %c0_i32, %c0_i32_0 : i32, i32, i32
  }
  func.func @transform_1(%arg0: i32) -> (i32, i32, i32) {
    %c0_i32 = arith.constant 0 : i32
    %c0_i32_0 = arith.constant 0 : i32
    %c0_i32_1 = arith.constant 0 : i32
    %c0_i32_2 = arith.constant 0 : i32
    return %c0_i32, %c0_i32_0, %c0_i32_1 : i32, i32, i32
  }
  func.func @transform_2(%arg0: i32) -> (i32, i32) {
    %c0_i32 = arith.constant 0 : i32
    %c0_i32_0 = arith.constant 0 : i32
    %c0_i32_1 = arith.constant 0 : i32
    return %c0_i32, %c0_i32_0 : i32, i32
  }
  func.func @transform_3(%arg0: i32) -> (i32, i32) {
    %c0_i32 = arith.constant 0 : i32
    %c0_i32_0 = arith.constant 0 : i32
    %c0_i32_1 = arith.constant 0 : i32
    return %c0_i32, %c0_i32_0 : i32, i32
  }
  func.func @transform_4(%arg0: i32) -> (i32, i32, i32) {
    %c0_i32 = arith.constant 0 : i32
    %c0_i32_0 = arith.constant 0 : i32
    %c0_i32_1 = arith.constant 0 : i32
    return %arg0, %c0_i32, %c0_i32_0 : i32, i32, i32
  }
  func.func @transform_5(%arg0: i32) -> (i32, i32, i32) {
    %c0_i32 = arith.constant 0 : i32
    %c0_i32_0 = arith.constant 0 : i32
    %c0_i32_1 = arith.constant 0 : i32
    return %arg0, %c0_i32, %c0_i32_0 : i32, i32, i32
  }
}

</mosaic_0001>

<bundles_post_ra>
// kernel: residual_block_forward.2
= control target key start
LH: loop header
LB: loop body
LE: loop exit
PB: predicated region body
PF: predicated region fallthrough
CT: control target
= control target key end

     0   :  { %s1012_s18 = smov 0   ;;  %s1097_s0 = inlined_call_operand.vmem [shape: bf16[2,18,64], index: 0, kind: input, shape index: {}]   ;;  %s1098_s1 = inlined_call_operand.vmem [shape: bf16[3,64,128], index: 1, kind: input, shape index: {}]   ;;  %s1099_s2 = inlined_call_operand.vmem [shape: bf16[64,128], index: 2, kind: input, shape index: {}]   ;;  %s1100_s3 = inlined_call_operand.vmem [shape: bf16[2,16,128], index: 3, kind: output, shape index: {0}]   ;;  %s1101_s4 = inlined_call_operand.vmem [shape: bf16[2,16,128], index: 4, kind: output, shape index: {1}]   ;;  %s1102_s5 = inlined_call_operand.vmem [shape: f32[2,2,128], index: 5, kind: output, shape index: {2}]  }
   0x1 LB: > { %s803_s19 = sadd.s32 4294967295, %s980_s18   ;;  %p807_p0 = scmp.ge.s32.totalorder %s980_s18, 1  ;;  %s980_s18 = sphi %s1012_s18, %s16_s18  }
   0x2   : > { %p192_p1 = scmp.lt.s32.totalorder %s980_s18, 3 }
   0x4   : > { %p193_p2 = pnand %p807_p0, %p192_p1 }
   0x5   : > { %v956_v0 = vld [vmem:[%s1098_s1] sm:$0xff] (!%p193_p2)   ;;  %p229_p3 = scmp.lt.s32.totalorder (!%p193_p2), %s803_s19, 1  ;;  %v958_v2 = vld [vmem:[%s1098_s1 + $0x8] sm:$0xff] (!%p193_p2)   ;;  %v960_v4 = vld [vmem:[%s1098_s1 + $0x10] sm:$0xff] (!%p193_p2)   ;;  %vm292_vm0 = vcmask (!%p193_p2), 523264   ;;  %vm511_vm1 = vcmask (!%p193_p2), 1046528  }
   0x6   : > { %196 = sbr.rel (%p193_p2) target bundleno = 276 (0x114), region = 32  ;;  %v957_v1 = vld [vmem:[%s1098_s1 + $0x20] sm:$0xff] (!%p193_p2)   ;;  %899 = vmatprep.subr.bf16.mxu0 (!%p193_p2), %v956_v0  ;;  %v959_v3 = vld [vmem:[%s1098_s1 + $0x28] sm:$0xff] (!%p193_p2)   ;;  %v961_v5 = vld [vmem:[%s1098_s1 + $0x30] sm:$0xff] (!%p193_p2)   ;;  %vm524_vm2 = vcmask (!%p193_p2), 1045504   ;;  %vm681_vm6 = vcmask (!%p193_p2), 1040384  }
   0x7   : > { %911 = vmatprep.subr.bf16.mxu1 (!%p193_p2), %v957_v1  ;;  %900 = vmatpush3.bf16.msra.mxu0 (!%p193_p2), %v956_v0  ;;  %v962_v6 = vld [vmem:[%s1098_s1 + $0x18] sm:$0xff] (!%p193_p2)   ;;  %v966_v10 = vld [vmem:[%s1098_s1 + $0x40] sm:$0xff] (!%p193_p2)   ;;  %v967_v12 = vld [vmem:[%s1098_s1 + $0x48] sm:$0xff] (!%p193_p2)   ;;  %vm634_vm3 = vsmask.f32 (!%p193_p2), 3328 }
   0x8   : > { %912 = vmatpush3.bf16.msra.mxu1 (!%p193_p2), %v957_v1  ;;  %901 = vmatprep.subr.bf16.mxu0 (!%p193_p2), %v958_v2  ;;  %v963_v8 = vld [vmem:[%s1098_s1 + $0x38] sm:$0xff] (!%p193_p2)   ;;  %v968_v11 = vld [vmem:[%s1099_s2] sm:$0xff] (!%p193_p2)   ;;  %v970_v13 = vld [vmem:[%s1099_s2 + $0x8] sm:$0xff] (!%p193_p2)   ;;  %vm635_vm4 = vsmask.f32 (!%p193_p2), 7440 }
   0x9   : > { %913 = vmatprep.subr.bf16.mxu1 (!%p193_p2), %v959_v3  ;;  %v969_v14 = vld [vmem:[%s1098_s1 + $0x50] sm:$0xff] (!%p193_p2)   ;;  %v971_v16 = vld [vmem:[%s1098_s1 + $0x58] sm:$0xff] (!%p193_p2)   ;;  %vm636_vm5 = vmor (!%p193_p2), %vm634_vm3, %vm635_vm4 }
   0xa   : > { %v972_v15 = vld [vmem:[%s1099_s2 + $0x10] sm:$0xff] (!%p193_p2)   ;;  %v973_v17 = vld [vmem:[%s1099_s2 + $0x18] sm:$0xff] (!%p193_p2)  }
   0xb   : > { %902 = vmatpush3.bf16.msra.mxu0 (!%p193_p2), %v958_v2 }
   0xc   : > { %914 = vmatpush3.bf16.msra.mxu1 (!%p193_p2), %v959_v3  ;;  %903 = vmatprep.subr.bf16.mxu0 (!%p193_p2), %v960_v4 }
   0xd   : > { %s1104_s19 = smov (!%p229_p3, %s803_s19), 1  ;;  %915 = vmatprep.subr.bf16.mxu1 %v961_v5 }
   0xe   : > { %s947_s30 = smul.u32 12, %s1104_s19  ;;  %s863_s8 = sshll.u32 %s1104_s19, 3 }
   0xf   : > { %904 = vmatpush3.bf16.msra.mxu0 %v960_v4  ;;  %s238_s11 = scalar_lea.vmem %s1100_s3, %s863_s8  ;;  %s243_s14 = scalar_lea.vmem %s1101_s4, %s863_s8 }
  0x10   : > { %s233_s10 = scalar_lea.vmem %s1097_s0, %s947_s30  ;;  %916 = vmatpush3.bf16.msra.mxu1 %v961_v5  ;;  %905 = vmatprep.subr.bf16.mxu0 %v962_v6  ;;  %s813_s15 = sshll.u32 %s1104_s19, 1 }
  0x11   : > { %v964_v7 = vld [vmem:[%s233_s10] sm:$0xff]   ;;  %v965_v9 = vld [vmem:[%s233_s10 + $0x8] ss:$0 sps:$4 sm:$0x11]   ;;  %917 = vmatprep.subr.bf16.mxu1 %v963_v8  ;;  %s247_s20 = scalar_lea.vmem %s1102_s5, %s813_s15 }
  0x12   : > { %907 = vmatprep.mubr.msk.bf16.mxu0 %vm292_vm0, %v964_v7  ;;  %919 = vmatprep.mubr.msk.bf16.mxu1 %vm292_vm0, %v964_v7 }
  0x13   : > { %906 = vmatpush3.bf16.msra.mxu0 %v962_v6 }
  0x14   : > { %918 = vmatpush3.bf16.msra.mxu1 %v963_v8  ;;  %923 = vmatprep.subr.bf16.mxu0 %v966_v10 }
  0x15   : > { %935 = vmatprep.subr.bf16.mxu1 %v968_v11 }
  0x16   : > { %908 = vmatmul.mubr.msk.bf16.vlgmr.msra.gmra.mrb[0].mxu0 %vm292_vm0, %v965_v9 }
  0x17   : > { %920 = vmatmul.mubr.msk.bf16.vlgmr.msra.gmra.mrb[0].mxu1 %vm292_vm0, %v965_v9  ;;  %924 = vmatpush3.bf16.msra.mxu0 %v966_v10 }
  0x18   : > { %925 = vmatprep.subr.bf16.mxu0 %v967_v12  ;;  %936 = vmatpush3.bf16.msra.mxu1 %v968_v11 }
  0x19   : > { %937 = vmatprep.subr.bf16.mxu1 %v970_v13  ;;  %931 = vmatprep.mubr.msk.bf16.mxu0 %vm292_vm0, %v964_v7 }
  0x1a   : > { %943 = vmatprep.mubr.msk.bf16.mxu1 %vm292_vm0, %v964_v7 }
  0x1b   : > { %926 = vmatpush3.bf16.msra.mxu0 %v967_v12 }
  0x1c   : > { %927 = vmatprep.subr.bf16.mxu0 %v969_v14  ;;  %938 = vmatpush3.bf16.msra.mxu1 %v970_v13 }
  0x1d   : > { %939 = vmatprep.subr.bf16.mxu1 %v972_v15 }
  0x1f   : > { %928 = vmatpush3.bf16.msra.mxu0 %v969_v14 }
  0x20   : > { %929 = vmatprep.subr.bf16.mxu0 %v971_v16  ;;  %940 = vmatpush3.bf16.msra.mxu1 %v972_v15 }
  0x21   : > { %941 = vmatprep.subr.bf16.mxu1 %v973_v17 }
  0x23   : > { %930 = vmatpush3.bf16.msra.mxu0 %v971_v16 }
  0x24   : > { %942 = vmatpush3.bf16.msra.mxu1 %v973_v17 }
  0x26   : > { %932 = vmatmul.mubr.msk.bf16.vlgmr.msra.gmra.mrb[4].mxu0 %vm292_vm0, %v965_v9 }
  0x27   : > { %944 = vmatmul.mubr.msk.bf16.vlgmr.msra.gmra.mrb[4].mxu1 %vm292_vm0, %v965_v9 }
  0xe9   : > { %v909_v18 = vpop.f32.mrb[0].mxu0 }
  0xea   : > { %v921_v19 = vpop.f32.mrb[0].mxu1  ;;  %v333_v20 = vpop.f32.mrb[1].mxu0 }
  0xeb   : > { %v413_v21 = vpop.f32.mrb[1].mxu1  ;;  %v910_v22 = vpop.f32.mrb[2].mxu0  ;;  %v515_v23 = vrot.slane %v921_v19, 1 }
  0xec   : > { %v512_v24 = vrot.slane %v413_v21, 1  ;;  %v922_v25 = vpop.f32.mrb[2].mxu1  ;;  %v336_v26 = vpop.f32.mrb[3].mxu0 }
  0xed   : > { %v416_v27 = vpop.f32.mrb[3].mxu1 }
  0xee   : > { %v513_v28 = vrot.slane %v416_v27, 1 }
  0xf0   : > { %v514_v29 = vsel %vm511_vm1, %v512_v24, %v513_v28  ;;  %v516_v30 = vsel %vm511_vm1, %v513_v28, %v515_v23 }
  0xf1   : > { %v519_v31 = vadd.f32 %v514_v29, %v333_v20  ;;  %v520_v32 = vadd.f32 %v516_v30, %v336_v26 }
  0xf9   : > { %v933_v33 = vpop.f32.mrb[4].mxu0 }
  0xfa   : > { %v494_v34 = vpop.f32.mrb[5].mxu0  ;;  %v945_v35 = vpop.f32.mrb[4].mxu1  ;;  %v528_v41 = vrot.slane %v933_v33, 2 }
  0xfb   : > { %v934_v36 = vpop.f32.mrb[6].mxu0  ;;  %v610_v37 = vpop.f32.mrb[5].mxu1  ;;  %v525_v42 = vrot.slane %v494_v34, 2  ;;  %v869_v44 = vpack.c.bf16 %v945_v35, %v945_v35 }
  0xfc   : > { %v497_v38 = vpop.f32.mrb[7].mxu0  ;;  %v867_v39 = vpack.c.bf16 %v610_v37, %v610_v37  ;;  %v946_v40 = vpop.f32.mrb[6].mxu1 }
  0xfd   : > { %v526_v43 = vrot.slane %v497_v38, 2  ;;  %v613_v45 = vpop.f32.mrb[7].mxu1  ;;  %v657_v55 = vshll.u32 %v869_v44, 16 }
  0xfe   : > { %v638_v46 = vshrl.u32 %v867_v39, 16  ;;  %v641_v47 = vshll.u32 %v867_v39, 16  ;;  %v868_v48 = vpack.c.bf16 %v613_v45, %v613_v45 }
  0xff   : > { %v527_v49 = vsel %vm524_vm2, %v525_v42, %v526_v43  ;;  %v529_v50 = vsel %vm524_vm2, %v526_v43, %v528_v41  ;;  %v659_v3 = vrot.slane %v657_v55, 5 }
 0x100   : > { %v532_v51 = vadd.f32 %v527_v49, %v519_v31  ;;  %v533_v52 = vadd.f32 %v529_v50, %v520_v32  ;;  %v640_v53 = vrot.slane %v638_v46, 4  ;;  %v643_v54 = vrot.slane %v641_v47, 5 }
 0x101   : > { %v647_v56 = vshll.u32 %v868_v48, 16  ;;  %v651_v57 = vshrl.u32 %v868_v48, 16 }
 0x102   : > { %v873_v58 = vpack.c.bf16 %v533_v52, %v532_v51  ;;  %v665_v59 = vadd.f32 %v533_v52, %v532_v51  ;;  %v672_v60 = vmul.f32 %v532_v51, %v532_v51  ;;  %v673_v61 = vmul.f32 %v533_v52, %v533_v52 }
 0x103   : > { %v644_v62 = vor.u32 %v643_v54, %v640_v53  ;;  %v649_v63 = vrot.slane %v647_v56, 5  ;;  %v653_v0 = vrot.slane %v651_v57, 4 }
 0x104   : > { %v666_v1 = vrot.slane %v665_v59, 4  ;;  %v674_v2 = vadd.f32 %v673_v61, %v672_v60  ;;  %874 = vst [vmem:[%s238_s11] sm:$0xff] %v873_v58  }
 0x105   : > { %v645_v4 = vrot.slane %v644_v62, 4  ;;  %v654_v5 = vor.u32 %v653_v0, %v649_v63 }
 0x106   : > { %v667_v6 = vadd.f32 %v666_v1, %v665_v59  ;;  %v675_v7 = vrot.slane %v674_v2, 4 }
 0x107   : > { %v650_v8 = vsel %vm636_vm5, %v645_v4, %v649_v63  ;;  %v655_v9 = vrot.slane %v654_v5, 4 }
 0x108   : > { %v668_v10 = vrot.slane %v667_v6, 2  ;;  %v676_v11 = vadd.f32 %v675_v7, %v674_v2  ;;  %663 = vst [vmem:[%s243_s14] sm:$0xf] %v650_v8 }
 0x109   : > { %v660_v12 = vsel %vm636_vm5, %v655_v9, %v659_v3 }
 0x10a   : > { %v669_v13 = vadd.f32 %v668_v10, %v667_v6  ;;  %v677_v14 = vrot.slane %v676_v11, 2  ;;  %664 = vst [vmem:[%s243_s14 + $0x4] sm:$0xf] %v660_v12 }
 0x10c   : > { %v670_v15 = vrot.slane %v669_v13, 1  ;;  %v678_v16 = vadd.f32 %v677_v14, %v676_v11 }
 0x10e   : > { %v679_v17 = vrot.slane %v678_v16, 1  ;;  %v671_v18 = vadd.f32 %v670_v15, %v669_v13 }
 0x110   : > { %v680_v19 = vadd.f32 %v679_v17, %v678_v16 }
 0x112   : > { %v682_v20 = vsel %vm681_vm6, %v671_v18, %v680_v19 }
 0x113   : > { %683 = vst [vmem:[%s247_s20] sm:$0x3] %v682_v20 }
 0x114 PF: > { %s16_s18 = sadd.s32 1, %s980_s18  }
 0x115   : > { %p13_p4 = scmp.ge.s32.totalorder %s16_s18, 4  }
 0x117   :  { %15 = sbr.rel (!%p13_p4) target bundleno = 1 (0x1), region = 88 }

// kernel: residual_block_forward.3
= control target key start
LH: loop header
LB: loop body
LE: loop exit
PB: predicated region body
PF: predicated region fallthrough
CT: control target
= control target key end

     0   :  { %s1002_s18 = smov 0   ;;  %s1130_s0 = inlined_call_operand.vmem [shape: bf16[2,16,128], index: 0, kind: input, shape index: {}]   ;;  %s1131_s1 = inlined_call_operand.vmem [shape: bf16[3,128,128], index: 1, kind: input, shape index: {}]   ;;  %s1132_s2 = inlined_call_operand.vmem [shape: f32[1,128], index: 2, kind: input, shape index: {}]   ;;  %s1133_s3 = inlined_call_operand.vmem [shape: f32[1,128], index: 3, kind: input, shape index: {}]   ;;  %s1134_s4 = inlined_call_operand.vmem [shape: f32[2,16,128], index: 4, kind: output, shape index: {0}]   ;;  %s1135_s5 = inlined_call_operand.vmem [shape: f32[2,2,128], index: 5, kind: output, shape index: {1}]  }
   0x1 LB: > { %s743_s19 = sadd.s32 4294967295, %s969_s18   ;;  %p747_p0 = scmp.ge.s32.totalorder %s969_s18, 1  ;;  %s969_s18 = sphi %s1002_s18, %s16_s18  }
   0x2   : > { %p190_p1 = scmp.lt.s32.totalorder %s969_s18, 3 }
   0x4   : > { %p191_p2 = pnand %p747_p0, %p190_p1 }
   0x5   : > { %v939_v0 = vld [vmem:[%s1131_s1] sm:$0xff] (!%p191_p2)   ;;  %v941_v2 = vld [vmem:[%s1131_s1 + $0x8] sm:$0xff] (!%p191_p2)   ;;  %p222_p3 = scmp.lt.s32.totalorder (!%p191_p2), %s743_s19, 1  ;;  %v943_v4 = vld [vmem:[%s1131_s1 + $0x10] sm:$0xff] (!%p191_p2)   ;;  %vm263_vm0 = vcmask (!%p191_p2), 1040384   ;;  %vm971_vm2 = vmmov (!%p191_p2), 1  }
   0x6   : > { %194 = sbr.rel (%p191_p2) target bundleno = 308 (0x134), region = 36  ;;  %v940_v1 = vld [vmem:[%s1131_s1 + $0x40] sm:$0xff] (!%p191_p2)   ;;  %870 = vmatprep.subr.bf16.mxu0 (!%p191_p2), %v939_v0  ;;  %v942_v3 = vld [vmem:[%s1131_s1 + $0x48] sm:$0xff] (!%p191_p2)   ;;  %v944_v5 = vld [vmem:[%s1131_s1 + $0x50] sm:$0xff] (!%p191_p2)   ;;  %vm614_vm5 = vcmask (!%p191_p2), 1046528   ;;  %vm627_vm6 = vcmask (!%p191_p2), 1045504  }
   0x7   : > { %890 = vmatprep.subr.bf16.mxu1 (!%p191_p2), %v940_v1  ;;  %871 = vmatpush3.bf16.msra.mxu0 (!%p191_p2), %v939_v0  ;;  %v945_v6 = vld [vmem:[%s1131_s1 + $0x18] sm:$0xff] (!%p191_p2)   ;;  %v947_v8 = vld [vmem:[%s1131_s1 + $0x20] sm:$0xff] (!%p191_p2)   ;;  %v949_v10 = vld [vmem:[%s1131_s1 + $0x28] sm:$0xff] (!%p191_p2)  }
   0x8   : > { %891 = vmatpush3.bf16.msra.mxu1 (!%p191_p2), %v940_v1  ;;  %872 = vmatprep.subr.bf16.mxu0 (!%p191_p2), %v941_v2  ;;  %v946_v7 = vld [vmem:[%s1131_s1 + $0x58] sm:$0xff] (!%p191_p2)   ;;  %v948_v9 = vld [vmem:[%s1131_s1 + $0x60] sm:$0xff] (!%p191_p2)   ;;  %v950_v13 = vld [vmem:[%s1131_s1 + $0x68] sm:$0xff] (!%p191_p2)  }
   0x9   : > { %892 = vmatprep.subr.bf16.mxu1 (!%p191_p2), %v942_v3  ;;  %v753_v12 = vld [vmem:[%s1132_s2] ss:$0 sm:$0xff] (!%p191_p2)  ;;  %v951_v19 = vld [vmem:[%s1131_s1 + $0x30] sm:$0xff] (!%p191_p2)   ;;  %v953_v23 = vld [vmem:[%s1131_s1 + $0x38] sm:$0xff] (!%p191_p2)  }
   0xa   : > { %v754_v16 = vld [vmem:[%s1133_s3] ss:$0 sm:$0xff] (!%p191_p2)  ;;  %v952_v20 = vld [vmem:[%s1131_s1 + $0x70] sm:$0xff] (!%p191_p2)   ;;  %vm763_vm1 = vmneg (!%p191_p2), %vm263_vm0 }
   0xb   : > { %873 = vmatpush3.bf16.msra.mxu0 (!%p191_p2), %v941_v2  ;;  %v954_v26 = vld [vmem:[%s1131_s1 + $0x78] sm:$0xff] (!%p191_p2)   ;;  %vm1072_vm3 = vmpackc.low (!%p191_p2), %vm971_vm2, %vm763_vm1  ;;  %v955_v32 = vld [vmem:[%s1131_s1 + $0x80] sm:$0xff] (!%p191_p2)  }
   0xc   : > { %893 = vmatpush3.bf16.msra.mxu1 (!%p191_p2), %v942_v3  ;;  %874 = vmatprep.subr.bf16.mxu0 (!%p191_p2), %v943_v4  ;;  %vm1085_vm4 = vmpackc.low (!%p191_p2), %vm263_vm0, %vm263_vm0  ;;  %v956_v35 = vld [vmem:[%s1131_s1 + $0x88] sm:$0xff] (!%p191_p2)   ;;  %v957_v36 = vld [vmem:[%s1131_s1 + $0x90] sm:$0xff] (!%p191_p2)  }
   0xd   : > { %s1141_s19 = smov (!%p222_p3, %s743_s19), 1  ;;  %894 = vmatprep.subr.bf16.mxu1 %v944_v5  ;;  %v958_v37 = vld [vmem:[%s1131_s1 + $0x98] sm:$0xff]   ;;  %v959_v38 = vld [vmem:[%s1131_s1 + $0xa0] sm:$0xff]   ;;  %v960_v39 = vld [vmem:[%s1131_s1 + $0xa8] sm:$0xff]  }
   0xe   : > { %s834_s11 = sshll.u32 %s1141_s19, 3  ;;  %v961_v40 = vld [vmem:[%s1131_s1 + $0xb0] sm:$0xff]   ;;  %v962_v41 = vld [vmem:[%s1131_s1 + $0xb8] sm:$0xff]   ;;  %s835_s30 = sshll.u32 %s1141_s19, 4 }
   0xf   : > { %875 = vmatpush3.bf16.msra.mxu0 %v943_v4  ;;  %s226_s20 = scalar_lea.vmem %s1130_s0, %s834_s11  ;;  %s231_s8 = scalar_lea.vmem %s1134_s4, %s835_s30 }
  0x10   : > { %895 = vmatpush3.bf16.msra.mxu1 %v944_v5  ;;  %876 = vmatprep.subr.bf16.mxu0 %v945_v6  ;;  %v837_v11 = vld [vmem:[%s226_s20] sm:$0xff]   ;;  %s752_s9 = sshll.u32 %s1141_s19, 1 }
  0x11   : > { %896 = vmatprep.subr.bf16.mxu1 %v946_v7  ;;  %v838_v14 = vunpack.c.l.bf16 %v837_v11  ;;  %v839_v15 = vunpack.c.h.bf16 %v837_v11  ;;  %s235_s12 = scalar_lea.vmem %s1135_s5, %s752_s9 }
  0x13   : > { %877 = vmatpush3.bf16.msra.mxu0 %v945_v6  ;;  %v248_v17 = vmul.f32 %v838_v14, %v753_v12  ;;  %v249_v18 = vmul.f32 %v839_v15, %v753_v12 }
  0x14   : > { %897 = vmatpush3.bf16.msra.mxu1 %v946_v7  ;;  %878 = vmatprep.subr.bf16.mxu0 %v947_v8 }
  0x15   : > { %898 = vmatprep.subr.bf16.mxu1 %v948_v9  ;;  %v257_v21 = vadd.f32 %v754_v16, %v248_v17  ;;  %v258_v22 = vadd.f32 %v754_v16, %v249_v18 }
  0x17   : > { %879 = vmatpush3.bf16.msra.mxu0 %v947_v8  ;;  %v259_v24 = vmax.f32 %v257_v21, 0.0  ;;  %v260_v25 = vmax.f32 %v258_v22, 0.0 }
  0x18   : > { %899 = vmatpush3.bf16.msra.mxu1 %v948_v9  ;;  %880 = vmatprep.subr.bf16.mxu0 %v949_v10 }
  0x19   : > { %900 = vmatprep.subr.bf16.mxu1 %v950_v13  ;;  %v264_v27 = vrot.slane %v259_v24, 7  ;;  %v265_v28 = vrot.slane %v260_v25, 7 }
  0x1b   : > { %881 = vmatpush3.bf16.msra.mxu0 %v949_v10  ;;  %v266_v29 = vsel %vm263_vm0, %v264_v27, %v265_v28  ;;  %v768_v33 = vpack.c.bf16 %v265_v28, %v265_v28 }
  0x1c   : > { %901 = vmatpush3.bf16.msra.mxu1 %v950_v13  ;;  %882 = vmatprep.subr.bf16.mxu0 %v951_v19  ;;  %v765_v31 = vpack.c.bf16 %v266_v29, %v264_v27 }
  0x1d   : > { %902 = vmatprep.subr.bf16.mxu1 %v952_v20 }
  0x1e   : > { %886 = vmatprep.mubr.msk.bf16.mxu0 %vm1072_vm3, %v765_v31  ;;  %906 = vmatprep.mubr.msk.bf16.mxu1 %vm1072_vm3, %v765_v31 }
  0x1f   : > { %883 = vmatpush3.bf16.msra.mxu0 %v951_v19 }
  0x20   : > { %903 = vmatpush3.bf16.msra.mxu1 %v952_v20  ;;  %884 = vmatprep.subr.bf16.mxu0 %v953_v23 }
  0x21   : > { %904 = vmatprep.subr.bf16.mxu1 %v954_v26 }
  0x23   : > { %885 = vmatpush3.bf16.msra.mxu0 %v953_v23 }
  0x24   : > { %905 = vmatpush3.bf16.msra.mxu1 %v954_v26  ;;  %910 = vmatprep.subr.bf16.mxu0 %v955_v32 }
  0x26   : > { %887 = vmatmul.mubr.msk.bf16.vlgmr.msra.gmra.mrb[0].mxu0 %vm1085_vm4, %v768_v33 }
  0x27   : > { %907 = vmatmul.mubr.msk.bf16.vlgmr.msra.gmra.mrb[0].mxu1 %vm1085_vm4, %v768_v33  ;;  %911 = vmatpush3.bf16.msra.mxu0 %v955_v32 }
  0x28   : > { %912 = vmatprep.subr.bf16.mxu0 %v956_v35  ;;  %926 = vmatprep.mubr.msk.bf16.mxu0 %vm1072_vm3, %v765_v31 }
  0x2b   : > { %913 = vmatpush3.bf16.msra.mxu0 %v956_v35 }
  0x2c   : > { %914 = vmatprep.subr.bf16.mxu0 %v957_v36 }
  0x2f   : > { %915 = vmatpush3.bf16.msra.mxu0 %v957_v36 }
  0x30   : > { %916 = vmatprep.subr.bf16.mxu0 %v958_v37 }
  0x33   : > { %917 = vmatpush3.bf16.msra.mxu0 %v958_v37 }
  0x34   : > { %918 = vmatprep.subr.bf16.mxu0 %v959_v38 }
  0x37   : > { %919 = vmatpush3.bf16.msra.mxu0 %v959_v38 }
  0x38   : > { %920 = vmatprep.subr.bf16.mxu0 %v960_v39 }
  0x3b   : > { %921 = vmatpush3.bf16.msra.mxu0 %v960_v39 }
  0x3c   : > { %922 = vmatprep.subr.bf16.mxu0 %v961_v40 }
  0x3f   : > { %923 = vmatpush3.bf16.msra.mxu0 %v961_v40 }
  0x40   : > { %924 = vmatprep.subr.bf16.mxu0 %v962_v41 }
  0x43   : > { %925 = vmatpush3.bf16.msra.mxu0 %v962_v41 }
  0x46   : > { %927 = vmatmul.mubr.msk.bf16.vlgmr.msra.gmra.mrb[4].mxu0 %vm1085_vm4, %v768_v33 }
  0xf9   : > { %v888_v42 = vpop.f32.mrb[0].mxu0 }
  0xfa   : > { %v908_v43 = vpop.f32.mrb[0].mxu1  ;;  %v372_v44 = vpop.f32.mrb[1].mxu0 }
  0xfb   : > { %v484_v45 = vpop.f32.mrb[1].mxu1  ;;  %v889_v46 = vpop.f32.mrb[2].mxu0  ;;  %v618_v47 = vrot.slane %v908_v43, 1 }
  0xfc   : > { %v615_v48 = vrot.slane %v484_v45, 1  ;;  %v909_v49 = vpop.f32.mrb[2].mxu1  ;;  %v375_v50 = vpop.f32.mrb[3].mxu0 }
  0xfd   : > { %v487_v51 = vpop.f32.mrb[3].mxu1 }
  0xfe   : > { %v616_v52 = vrot.slane %v487_v51, 1 }
 0x100   : > { %v617_v53 = vsel %vm614_vm5, %v615_v48, %v616_v52  ;;  %v619_v54 = vsel %vm614_vm5, %v616_v52, %v618_v47 }
 0x101   : > { %v622_v55 = vadd.f32 %v617_v53, %v372_v44  ;;  %v623_v56 = vadd.f32 %v619_v54, %v375_v50 }
 0x119   : > { %v928_v57 = vpop.f32.mrb[4].mxu0 }
 0x11a   : > { %v597_v58 = vpop.f32.mrb[5].mxu0  ;;  %v631_v61 = vrot.slane %v928_v57, 2 }
 0x11b   : > { %v929_v59 = vpop.f32.mrb[6].mxu0  ;;  %v628_v62 = vrot.slane %v597_v58, 2 }
 0x11c   : > { %v600_v60 = vpop.f32.mrb[7].mxu0 }
 0x11d   : > { %v629_v63 = vrot.slane %v600_v60, 2 }
 0x11f   : > { %v630_v0 = vsel %vm627_vm6, %v628_v62, %v629_v63  ;;  %v632_v1 = vsel %vm627_vm6, %v629_v63, %v631_v61 }
 0x120   : > { %v635_v2 = vadd.f32 %v630_v0, %v622_v55  ;;  %v636_v3 = vadd.f32 %v632_v1, %v623_v56 }
 0x122   : > { %637 = vst [vmem:[%s231_s8] sm:$0xff] %v635_v2  ;;  %638 = vst [vmem:[%s231_s8 + $0x8] sm:$0xff] %v636_v3  ;;  %v639_v4 = vadd.f32 %v636_v3, %v635_v2  ;;  %v646_v5 = vmul.f32 %v635_v2, %v635_v2  ;;  %v647_v6 = vmul.f32 %v636_v3, %v636_v3 }
 0x124   : > { %v640_v7 = vrot.slane %v639_v4, 4  ;;  %v648_v8 = vadd.f32 %v647_v6, %v646_v5 }
 0x126   : > { %v641_v9 = vadd.f32 %v640_v7, %v639_v4  ;;  %v649_v10 = vrot.slane %v648_v8, 4 }
 0x128   : > { %v642_v11 = vrot.slane %v641_v9, 2  ;;  %v650_v12 = vadd.f32 %v649_v10, %v648_v8 }
 0x12a   : > { %v643_v13 = vadd.f32 %v642_v11, %v641_v9  ;;  %v651_v14 = vrot.slane %v650_v12, 2 }
 0x12c   : > { %v644_v15 = vrot.slane %v643_v13, 1  ;;  %v652_v16 = vadd.f32 %v651_v14, %v650_v12 }
 0x12e   : > { %v653_v17 = vrot.slane %v652_v16, 1  ;;  %v645_v18 = vadd.f32 %v644_v15, %v643_v13 }
 0x130   : > { %v654_v19 = vadd.f32 %v653_v17, %v652_v16 }
 0x132   : > { %v655_v20 = vsel %vm263_vm0, %v645_v18, %v654_v19 }
 0x133   : > { %656 = vst [vmem:[%s235_s12] sm:$0x3] %v655_v20 }
 0x134 PF: > { %s16_s18 = sadd.s32 1, %s969_s18  }
 0x135   : > { %p13_p4 = scmp.ge.s32.totalorder %s16_s18, 4  }
 0x137   :  { %15 = sbr.rel (!%p13_p4) target bundleno = 1 (0x1), region = 80 }

</bundles_post_ra>
